<compile_context>
chip_gen: v5e
topology: v5e:2x2
jax: 0.10.0
libtpu: 0.0.40
codegen_flags: <defaults>
</compile_context>

<pallas_src>
import functools

import jax
import jax.numpy as jnp
from jax import lax
from jax.experimental import pallas as pl
from jax.experimental.pallas import tpu as pltpu


def _round_up(x: int, m: int) -> int:
    return ((x + m - 1) // m) * m


def _cdiv(a: int, b: int) -> int:
    return (a + b - 1) // b


def _vmem_capacity_bytes() -> int:
    try:
        return int(pltpu.get_tpu_info().vmem_capacity_bytes)
    except Exception:
        return 64 << 20  # conservative per-TC floor (v7x)


def _split_dim(size: int, target: int, base: int):
    """Pad `size` to a multiple of `base`, then split into near-equal tiles
    (each a multiple of `base`) of roughly `target` elements.
    Returns (tile, padded_size) with tile dividing padded_size."""
    padded = _round_up(size, base)
    n = max(1, _cdiv(padded, max(target, base)))
    tile = _round_up(_cdiv(padded, n), base)
    return tile, n * tile


def _pick_tiles(M, N, K, in_isz, out_isz, sub, budget):
    """Choose (tm, tn, tk) and padded dims that fit the VMEM budget."""
    decode = _round_up(M, sub) <= 256
    if decode:
        # Skinny matmul: weight-bandwidth stream.  Collapse the K grid axis
        # (full K per step) and widen N.
        tm_t = _round_up(M, sub)
        tn_t = 512
        tk_t = _round_up(K, 128)
    else:
        tm_t, tn_t = 512, 512
        tk_t = 2048 if in_isz <= 2 else 1024

    while True:
        tm, Mp = _split_dim(M, tm_t, sub)
        tn, Np = _split_dim(N, tn_t, 128)
        tk, Kp = _split_dim(K, tk_t, 128)
        usage = (
            2 * (tm * tk + tn * tk) * in_isz  # double-buffered x / W tiles
            + 2 * tn * 4                      # double-buffered bias (f32)
            + 2 * tm * tn * out_isz           # double-buffered output tile
            + tm * tn * 4                     # f32 accumulator scratch
        )
        if usage <= budget:
            return tm, tn, tk, Mp, Np, Kp, usage
        # Shrink tk first (HBM re-fetch depends on tm/tn, not tk), then tn/tm.
        if tk_t > 512:
            tk_t //= 2
        elif tn_t > 256:
            tn_t //= 2
        elif tm_t > 256:
            tm_t //= 2
        elif tk_t > 128:
            tk_t //= 2
        elif tn_t > 128:
            tn_t //= 2
        elif tm_t > sub:
            tm_t = max(sub, tm_t // 2)
        else:
            return tm, tn, tk, Mp, Np, Kp, usage  # minimal tiles


def _linear_kernel(x_ref, w_ref, b_ref, o_ref, acc_ref):
    # x_ref: (tm, tk)   activation tile (compute dtype)
    # w_ref: (tn, tk)   weight tile in torch [out, in] layout (compute dtype)
    # b_ref: (1, tn)    bias tile (f32)
    # o_ref: (tm, tn)   output tile (original dtype)
    # acc_ref: (tm, tn) f32 accumulator scratch, persists across the K axis
    k = pl.program_id(2)

    @pl.when(k == 0)
    def _():
        # Fold the bias into the accumulator init -> pure cast/store epilogue.
        acc_ref[...] = jnp.broadcast_to(
            b_ref[...].astype(jnp.float32), acc_ref.shape
        )

    # Contract x's last dim with W's last dim: (tm, tk) . (tn, tk) -> (tm, tn).
    acc_ref[...] += lax.dot_general(
        x_ref[...],
        w_ref[...],
        dimension_numbers=(((1,), (1,)), ((), ())),
        preferred_element_type=jnp.float32,
    )

    @pl.when(k == pl.num_programs(2) - 1)
    def _():
        o_ref[...] = acc_ref[...].astype(o_ref.dtype)


@functools.partial(jax.jit, static_argnames=("use_bf16",))
def super_layer_forward(x, weight, bias, *, use_bf16=True):
    """SuperLayer.forward == Linear.forward: x @ weight.T + bias.

    x:      [..., in_features]
    weight: [out_features, in_features]   (torch Linear layout, NOT transposed)
    bias:   [out_features]
    use_bf16: cast f32 inputs/weights to bf16 for the MXU (f32 accumulation,
              f32 bias add); set False for exact f32 numerics.
    """
    orig_shape = x.shape
    in_features = orig_shape[-1]
    out_features = weight.shape[0]
    out_dtype = x.dtype

    x2d = x.reshape(-1, in_features)  # (M, K)
    M, K = x2d.shape
    N = out_features

    # Compute dtype (MXU inputs).
    if use_bf16 and x.dtype == jnp.float32:
        compute_dtype = jnp.bfloat16
    else:
        compute_dtype = x.dtype
    in_isz = jnp.dtype(compute_dtype).itemsize
    out_isz = jnp.dtype(out_dtype).itemsize
    sub = 16 if in_isz < 4 else 8  # sublane multiple for the compute dtype

    # Generation-aware VMEM budget: 75% of physical for tile fitting,
    # up to 85% for the compiler's scoped limit.
    vmem_cap = _vmem_capacity_bytes()
    budget = int(vmem_cap * 0.75)

    tm, tn, tk, Mp, Np, Kp, usage = _pick_tiles(
        M, N, K, in_isz, out_isz, sub, budget
    )

    # Minimal zero-padding (at most one base-group per axis plus the split
    # remainder): zeros in K contribute nothing; padded M/N sliced off below.
    x2d = x2d.astype(compute_dtype)
    if (Mp, Kp) != (M, K):
        x2d = jnp.pad(x2d, ((0, Mp - M), (0, Kp - K)))
    w = weight.astype(compute_dtype)
    if (Np, Kp) != (N, K):
        w = jnp.pad(w, ((0, Np - N), (0, Kp - K)))
    b2d = bias.astype(jnp.float32)
    if Np != N:
        b2d = jnp.pad(b2d, (0, Np - N))
    b2d = b2d.reshape(1, Np)

    grid_m, grid_n, grid_k = Mp // tm, Np // tn, Kp // tk
    grid = (grid_m, grid_n, grid_k)

    vmem_limit = int(min(int(vmem_cap * 0.85), max(2 * usage, 32 << 20)))

    # Account for HBM re-fetch of x (once per N block) and W (once per M
    # block) so XLA's scheduler sees the real traffic.
    cost = pl.CostEstimate(
        flops=2 * Mp * Np * Kp,
        transcendentals=0,
        bytes_accessed=(
            (Mp * Kp * grid_n + Np * Kp * grid_m) * in_isz
            + Mp * Np * out_isz
            + Np * 4
        ),
    )

    out = pl.pallas_call(
        _linear_kernel,
        out_shape=jax.ShapeDtypeStruct((Mp, Np), out_dtype),
        grid_spec=pltpu.PrefetchScalarGridSpec(
            num_scalar_prefetch=0,
            grid=grid,
            in_specs=[
                pl.BlockSpec((tm, tk), lambda i, j, k: (i, k)),  # x tile
                pl.BlockSpec((tn, tk), lambda i, j, k: (j, k)),  # weight tile
                pl.BlockSpec((1, tn), lambda i, j, k: (0, j)),   # bias tile
            ],
            out_specs=pl.BlockSpec((tm, tn), lambda i, j, k: (i, j)),
            scratch_shapes=[pltpu.VMEM((tm, tn), jnp.float32)],
        ),
        compiler_params=pltpu.CompilerParams(
            dimension_semantics=("parallel", "parallel", "arbitrary"),
            vmem_limit_bytes=vmem_limit,
        ),
        cost_estimate=cost,
    )(x2d, w, b2d)

    out = out[:M, :N]
    return out.reshape(*orig_shape[:-1], out_features)


def _bf16_ref(x, w, b):
    """Reference matching the bf16-input / f32-accumulate kernel numerics."""
    xb = x.astype(jnp.bfloat16).astype(jnp.float32)
    wb = w.astype(jnp.bfloat16).astype(jnp.float32)
    return xb @ wb.T + b


if __name__ == "__main__":
    key = jax.random.PRNGKey(0)
    kx, kw, kb, kx2, kw2, kb2 = jax.random.split(key, 6)

    # Case 1: small shapes consistent with a Linear-wrapping SuperLayer,
    # default bf16-compute path (f32 accumulation).
    batch, seq, in_features, out_features = 2, 8, 32, 64
    x = jax.random.normal(kx, (batch, seq, in_features), dtype=jnp.float32)
    weight = (
        jax.random.normal(kw, (out_features, in_features), dtype=jnp.float32)
        * 0.05
    )
    bias = jax.random.normal(kb, (out_features,), dtype=jnp.float32) * 0.01

    y = super_layer_forward(x, weight, bias)
    y = jax.block_until_ready(y)
    assert y.shape == (batch, seq, out_features)
    ref_bf16 = _bf16_ref(x, weight, bias)
    assert jnp.allclose(y, ref_bf16, atol=2e-3, rtol=2e-3)
    # Sanity vs. the pure-f32 torch reference (bf16 input quantization error).
    ref_f32 = x @ weight.T + bias
    assert jnp.allclose(y, ref_f32, atol=3e-2, rtol=3e-2)

    # Case 1b: exact f32 path (opt-out of the bf16 cast).
    y32 = super_layer_forward(x, weight, bias, use_bf16=False)
    y32 = jax.block_until_ready(y32)
    assert jnp.allclose(y32, ref_f32, atol=1e-5, rtol=1e-5)

    # Case 2: non-tile-multiple M/N/K to exercise remainder (padding) handling
    # on the default bf16 path.
    b2_, s2_, kin2, kout2 = 3, 5, 200, 300
    x2 = jax.random.normal(kx2, (b2_, s2_, kin2), dtype=jnp.float32)
    w2 = jax.random.normal(kw2, (kout2, kin2), dtype=jnp.float32) * 0.02
    bia2 = jax.random.normal(kb2, (kout2,), dtype=jnp.float32) * 0.01

    y2 = super_layer_forward(x2, w2, bia2)
    y2 = jax.block_until_ready(y2)
    assert y2.shape == (b2_, s2_, kout2)
    ref2_bf16 = _bf16_ref(x2, w2, bia2)
    assert jnp.allclose(y2, ref2_bf16, atol=2e-3, rtol=2e-3)

    print("KERNEL_OK")
</pallas_src>

<mosaic_0001>
module attributes {stable_mosaic.version = 11 : i64} {
  func.func @_linear_kernel(%arg0: i32, %arg1: i32, %arg2: i32, %arg3: memref<16x128xbf16, #tpu.memory_space<vmem>>, %arg4: memref<128x128xbf16, #tpu.memory_space<vmem>>, %arg5: memref<1x128xf32, #tpu.memory_space<vmem>>, %arg6: memref<16x128xf32, #tpu.memory_space<vmem>>, %arg7: memref<16x128xf32, #tpu.memory_space<vmem>>) attributes {dimension_semantics = [#tpu.dimension_semantics<parallel>, #tpu.dimension_semantics<parallel>, #tpu.dimension_semantics<arbitrary>], iteration_bounds = array<i64: 1, 1, 1>, scalar_prefetch = 0 : i64, scratch_operands = 1 : i64, tpu.core_type = #tpu.core_type<tc>, window_params = [{transform_indices = @transform_0, window_bounds = array<i64: 16, 128>}, {transform_indices = @transform_1, window_bounds = array<i64: 128, 128>}, {transform_indices = @transform_2, window_bounds = array<i64: 1, 128>}, {transform_indices = @transform_3, window_bounds = array<i64: 16, 128>}]} {
    %c0_i32 = arith.constant 0 : i32
    %0 = arith.cmpi eq, %arg2, %c0_i32 : i32
    %1 = arith.extui %0 : i1 to i32
    %c0_i32_0 = arith.constant 0 : i32
    %2 = arith.cmpi ne, %1, %c0_i32_0 : i32
    scf.if %2 {
      %c0_10 = arith.constant 0 : index
      %c0_11 = arith.constant 0 : index
      %12 = vector.load %arg5[%c0_10, %c0_11] : memref<1x128xf32, #tpu.memory_space<vmem>>, vector<1x128xf32>
      %13 = vector.shape_cast %12 : vector<1x128xf32> to vector<1x128xf32>
      %14 = vector.broadcast %13 : vector<1x128xf32> to vector<16x128xf32>
      %c0_12 = arith.constant 0 : index
      %c0_13 = arith.constant 0 : index
      %15 = vector.load %arg7[%c0_12, %c0_13] : memref<16x128xf32, #tpu.memory_space<vmem>>, vector<16x128xf32>
      tpu.vector_store %arg7[%c0_12, %c0_13], %14 {strides = array<i32>} : memref<16x128xf32, #tpu.memory_space<vmem>>, vector<16x128xf32>,
    } else {
    }
    %c0 = arith.constant 0 : index
    %c0_1 = arith.constant 0 : index
    %3 = vector.load %arg7[%c0, %c0_1] : memref<16x128xf32, #tpu.memory_space<vmem>>, vector<16x128xf32>
    %c0_2 = arith.constant 0 : index
    %c0_3 = arith.constant 0 : index
    %4 = vector.load %arg3[%c0_2, %c0_3] : memref<16x128xbf16, #tpu.memory_space<vmem>>, vector<16x128xbf16>
    %c0_4 = arith.constant 0 : index
    %c0_5 = arith.constant 0 : index
    %5 = vector.load %arg4[%c0_4, %c0_5] : memref<128x128xbf16, #tpu.memory_space<vmem>>, vector<128x128xbf16>
    %cst = arith.constant dense<0.000000e+00> : vector<16x128xf32>
    %6 = tpu.matmul %4, %5, %cst {dimension_numbers = #tpu.dot_dimension_numbers<[1], [1], [0], [0], [0, 0, 1, 0], [], []>} : vector<16x128xbf16>, vector<128x128xbf16>, vector<16x128xf32> -> vector<16x128xf32>
    %7 = arith.addf %3, %6 : vector<16x128xf32>
    %c0_6 = arith.constant 0 : index
    %c0_7 = arith.constant 0 : index
    %8 = vector.load %arg7[%c0_6, %c0_7] : memref<16x128xf32, #tpu.memory_space<vmem>>, vector<16x128xf32>
    tpu.vector_store %arg7[%c0_6, %c0_7], %7 {strides = array<i32>} : memref<16x128xf32, #tpu.memory_space<vmem>>, vector<16x128xf32>,
    %c0_i32_8 = arith.constant 0 : i32
    %9 = arith.cmpi eq, %arg2, %c0_i32_8 : i32
    %10 = arith.extui %9 : i1 to i32
    %c0_i32_9 = arith.constant 0 : i32
    %11 = arith.cmpi ne, %10, %c0_i32_9 : i32
    scf.if %11 {
      %c0_10 = arith.constant 0 : index
      %c0_11 = arith.constant 0 : index
      %12 = vector.load %arg7[%c0_10, %c0_11] : memref<16x128xf32, #tpu.memory_space<vmem>>, vector<16x128xf32>
      %c0_12 = arith.constant 0 : index
      %c0_13 = arith.constant 0 : index
      %13 = vector.load %arg6[%c0_12, %c0_13] : memref<16x128xf32, #tpu.memory_space<vmem>>, vector<16x128xf32>
      tpu.vector_store %arg6[%c0_12, %c0_13], %12 {strides = array<i32>} : memref<16x128xf32, #tpu.memory_space<vmem>>, vector<16x128xf32>,
    } else {
    }
    return
  }
  func.func @transform_0(%arg0: i32, %arg1: i32, %arg2: i32) -> (i32, i32) {
    %c0_i32 = arith.constant 0 : i32
    return %arg0, %arg2 : i32, i32
  }
  func.func @transform_1(%arg0: i32, %arg1: i32, %arg2: i32) -> (i32, i32) {
    %c0_i32 = arith.constant 0 : i32
    return %arg1, %arg2 : i32, i32
  }
  func.func @transform_2(%arg0: i32, %arg1: i32, %arg2: i32) -> (i32, i32) {
    %c0_i32 = arith.constant 0 : i32
    %c0_i32_0 = arith.constant 0 : i32
    return %c0_i32, %arg1 : i32, i32
  }
  func.func @transform_3(%arg0: i32, %arg1: i32, %arg2: i32) -> (i32, i32) {
    %c0_i32 = arith.constant 0 : i32
    return %arg0, %arg1 : i32, i32
  }
}

</mosaic_0001>

<bundles_post_ra>
// kernel: super_layer_forward.1
= control target key start
LH: loop header
LB: loop body
LE: loop exit
PB: predicated region body
PF: predicated region fallthrough
CT: control target
= control target key end

     0   :  { %s229_s1 = inlined_call_operand.vmem [shape: bf16[128,128], index: 1, kind: input, shape index: {}]   ;;  %s230_s2 = inlined_call_operand.vmem [shape: f32[1,128], index: 2, kind: input, shape index: {}]   ;;  %s231_s0 = inlined_call_operand.vmem [shape: bf16[16,128], index: 0, kind: input, shape index: {}]   ;;  %s232_s3 = inlined_call_operand.vmem [shape: f32[16,128], index: 3, kind: output, shape index: {}]  }
   0x1   :  { %v171_v0 = vld [vmem:[%s229_s1 + $0x38] sm:$0xff]  ;;  %v170_v1 = vld [vmem:[%s229_s1 + $0x30] sm:$0xff]  ;;  %v169_v2 = vld [vmem:[%s229_s1 + $0x28] sm:$0xff] }
   0x2   :  { %98 = vmatpush.bf16.xpose.msra.mxu0 %v171_v0  ;;  %v168_v3 = vld [vmem:[%s229_s1 + $0x20] sm:$0xff]  ;;  %v167_v4 = vld [vmem:[%s229_s1 + $0x18] sm:$0xff]  ;;  %v166_v5 = vld [vmem:[%s229_s1 + $0x10] sm:$0xff] }
   0x3   :  { %v165_v6 = vld [vmem:[%s229_s1 + $0x8] sm:$0xff]  ;;  %v164_v7 = vld [vmem:[%s229_s1] sm:$0xff] }
   0x4   :  { %v163_v8 = vld [vmem:[%s231_s0] sm:$0xff] }
   0x5   :  { %v172_v9 = vld [vmem:[%s230_s2] ss:$0 sm:$0xff] }
   0xa   :  { %99 = vmatpush.bf16.xpose.msra.mxu0 %v170_v1 }
  0x12   :  { %100 = vmatpush.bf16.xpose.msra.mxu0 %v169_v2 }
  0x1a   :  { %101 = vmatpush.bf16.xpose.msra.mxu0 %v168_v3 }
  0x22   :  { %102 = vmatpush.bf16.xpose.msra.mxu0 %v167_v4 }
  0x2a   :  { %103 = vmatpush.bf16.xpose.msra.mxu0 %v166_v5 }
  0x32   :  { %104 = vmatpush.bf16.xpose.msra.mxu0 %v165_v6 }
  0x3a   :  { %105 = vmatpush.bf16.xpose.msra.mxu0 %v164_v7 }
  0x41   :  { %106 = vmatmul.bf16.vlgmr.msra.gmra.mxu0 %v163_v8 }
  0xbe   :  { %v107_v10 = vpop.f32.mrf.mxu0 }
  0xbf   :  { %v112_v11 = vadd.f32 %v172_v9, %v107_v10 }
  0xc1   :  { %121 = vst [vmem:[%s232_s3] sm:$0xff] %v112_v11 }
  0xc6   :  { %v109_v12 = vpop.f32.mrf.mxu0 }
  0xc7   :  { %v113_v13 = vadd.f32 %v172_v9, %v109_v12 }
  0xc9   :  { %122 = vst [vmem:[%s232_s3 + $0x8] sm:$0xff] %v113_v13 }

</bundles_post_ra>
